<compile_context>
chip_gen: v7x
topology: tpu7x:2x2x1
jax: 0.10.0
libtpu: 0.0.40
codegen_flags: <defaults>
</compile_context>

<pallas_src>
import functools
import math

import numpy as np
import jax
import jax.numpy as jnp
from jax.experimental import pallas as pl
from jax.experimental.pallas import tpu as pltpu

partial = functools.partial

_GN_FUSED_MAX_ELEMS = 1 << 20  # per-image HW*C above this -> tiled two-pass GN


# ----------------------------------------------------------------------------
# Tiled MXU matmul (bf16 inputs, f32 accumulation, gated bf16 final store)
# ----------------------------------------------------------------------------


def _matmul_kernel(a_ref, b_ref, o_ref, acc_ref):
    @pl.when(pl.program_id(2) == 0)
    def _():
        acc_ref[...] = jnp.zeros_like(acc_ref)

    acc_ref[...] += jnp.dot(a_ref[...], b_ref[...],
                            preferred_element_type=jnp.float32)

    @pl.when(pl.program_id(2) == pl.num_programs(2) - 1)
    def _():
        o_ref[...] = acc_ref[...].astype(o_ref.dtype)


def _round_up(v, m):
    return (v + m - 1) // m * m


def _pick_tm(M):
    for c in (256, 128, 64, 32, 16, 8):
        if M % c == 0:
            return c, M
    if M <= 256:
        return M, M                       # full-extent block (legal)
    return 128, _round_up(M, 128)         # rare fallback: pad M


def _pick_tn(N):
    for c in (512, 256, 128):
        if N % c == 0:
            return c, N
    if N <= 512:
        return N, N
    return 128, _round_up(N, 128)


def _pick_tk(K):
    if K <= 2048:
        return K, K                       # full-K block, no K loop, no padding
    for c in (2048, 1536, 1024, 512, 384, 256, 128):
        if K % c == 0:
            return c, K
    return 128, _round_up(K, 128)


def matmul(a, b, out_dtype=jnp.bfloat16):
    """(M, K) @ (K, N) -> (M, N).  bf16 MXU inputs, f32 accumulate, bf16 out."""
    M, K = a.shape
    _, N = b.shape
    tm, Mp = _pick_tm(M)
    tn, Np = _pick_tn(N)
    tk, Kp = _pick_tk(K)
    a_p = a.astype(jnp.bfloat16)
    b_p = b.astype(jnp.bfloat16)
    if Mp != M or Kp != K:
        a_p = jnp.pad(a_p, ((0, Mp - M), (0, Kp - K)))
    if Kp != K or Np != N:
        b_p = jnp.pad(b_p, ((0, Kp - K), (0, Np - N)))
    out = pl.pallas_call(
        _matmul_kernel,
        out_shape=jax.ShapeDtypeStruct((Mp, Np), out_dtype),
        grid_spec=pltpu.PrefetchScalarGridSpec(
            num_scalar_prefetch=0,
            grid=(Mp // tm, Np // tn, Kp // tk),
            in_specs=[pl.BlockSpec((tm, tk), lambda i, j, k: (i, k)),
                      pl.BlockSpec((tk, tn), lambda i, j, k: (k, j))],
            out_specs=pl.BlockSpec((tm, tn), lambda i, j, k: (i, j)),
            scratch_shapes=[pltpu.VMEM((tm, tn), jnp.float32)]),
        compiler_params=pltpu.CompilerParams(
            dimension_semantics=("parallel", "parallel", "arbitrary")),
    )(a_p, b_p)
    if Mp != M or Np != N:
        out = out[:M, :N]
    return out


# ----------------------------------------------------------------------------
# GroupNorm (+ fused ReLU / residual add), lane-dense NHWC layout
# ----------------------------------------------------------------------------


def _onehot_group_mats(C, G):
    Cg = C // G
    m_np = (np.arange(C)[:, None] // Cg == np.arange(G)[None, :]
            ).astype(np.float32)
    return jnp.asarray(m_np), jnp.asarray(m_np.T)


def _gn_fused_kernel(*refs, relu, eps, cg, has_res):
    if has_res:
        x_ref, res_ref, m_ref, mt_ref, g_ref, b_ref, o_ref = refs
    else:
        x_ref, m_ref, mt_ref, g_ref, b_ref, o_ref = refs
        res_ref = None
    x = x_ref[0].astype(jnp.float32)                     # (HW, C)
    hw = x.shape[0]
    cnt = float(hw * cg)
    s1 = jnp.sum(x, axis=0, keepdims=True)               # (1, C)
    s2 = jnp.sum(x * x, axis=0, keepdims=True)
    m = m_ref[...]                                       # (C, G) one-hot
    mt = mt_ref[...]                                     # (G, C)
    gsum = jnp.dot(s1, m, preferred_element_type=jnp.float32)
    gsq = jnp.dot(s2, m, preferred_element_type=jnp.float32)
    mean_g = gsum / cnt
    var_g = jnp.maximum(gsq / cnt - mean_g * mean_g, 0.0)
    inv_g = jax.lax.rsqrt(var_g + eps)
    mean_c = jnp.dot(mean_g, mt, preferred_element_type=jnp.float32)
    inv_c = jnp.dot(inv_g, mt, preferred_element_type=jnp.float32)
    y = (x - mean_c) * (inv_c * g_ref[...]) + b_ref[...]
    if has_res:
        y = y + res_ref[0].astype(jnp.float32)
    if relu:
        y = jnp.maximum(y, 0.0)
    o_ref[0] = y.astype(o_ref.dtype)


def _gn_stats_kernel(x_ref, m_ref, mt_ref, mean_ref, inv_ref,
                     s1_ref, s2_ref, *, eps, cg, hw):
    t = pl.program_id(1)

    @pl.when(t == 0)
    def _():
        s1_ref[...] = jnp.zeros_like(s1_ref)
        s2_ref[...] = jnp.zeros_like(s2_ref)

    x = x_ref[0].astype(jnp.float32)                     # (thw, C)
    s1_ref[...] += jnp.sum(x, axis=0, keepdims=True)
    s2_ref[...] += jnp.sum(x * x, axis=0, keepdims=True)

    @pl.when(t == pl.num_programs(1) - 1)
    def _():
        cnt = float(hw * cg)
        gsum = jnp.dot(s1_ref[...], m_ref[...],
                       preferred_element_type=jnp.float32)
        gsq = jnp.dot(s2_ref[...], m_ref[...],
                      preferred_element_type=jnp.float32)
        mean_g = gsum / cnt
        var_g = jnp.maximum(gsq / cnt - mean_g * mean_g, 0.0)
        inv_g = jax.lax.rsqrt(var_g + eps)
        mean_ref[0] = jnp.dot(mean_g, mt_ref[...],
                              preferred_element_type=jnp.float32)
        inv_ref[0] = jnp.dot(inv_g, mt_ref[...],
                             preferred_element_type=jnp.float32)


def _gn_norm_kernel(*refs, relu, has_res):
    if has_res:
        x_ref, res_ref, mean_ref, inv_ref, g_ref, b_ref, o_ref = refs
    else:
        x_ref, mean_ref, inv_ref, g_ref, b_ref, o_ref = refs
        res_ref = None
    x = x_ref[0].astype(jnp.float32)                     # (thw, C)
    y = (x - mean_ref[0]) * (inv_ref[0] * g_ref[...]) + b_ref[...]
    if has_res:
        y = y + res_ref[0].astype(jnp.float32)
    if relu:
        y = jnp.maximum(y, 0.0)
    o_ref[0] = y.astype(o_ref.dtype)


@partial(jax.jit, static_argnames=("num_groups", "relu", "eps"))
def _gn_fused(x, residual, gamma, beta, *, num_groups, relu, eps):
    N, H, W, C = x.shape
    G, Cg, hw = num_groups, C // num_groups, H * W
    xr = x.reshape(N, hw, C)
    m, mt = _onehot_group_mats(C, G)
    gr = gamma.reshape(1, C).astype(jnp.float32)
    br = beta.reshape(1, C).astype(jnp.float32)
    has_res = residual is not None
    operands = [xr]
    in_specs = [pl.BlockSpec((1, hw, C), lambda n: (n, 0, 0))]
    if has_res:
        operands.append(residual.reshape(N, hw, C))
        in_specs.append(pl.BlockSpec((1, hw, C), lambda n: (n, 0, 0)))
    operands += [m, mt, gr, br]
    in_specs += [pl.BlockSpec((C, G), lambda n: (0, 0)),
                 pl.BlockSpec((G, C), lambda n: (0, 0)),
                 pl.BlockSpec((1, C), lambda n: (0, 0)),
                 pl.BlockSpec((1, C), lambda n: (0, 0))]
    out = pl.pallas_call(
        partial(_gn_fused_kernel, relu=relu, eps=eps, cg=Cg, has_res=has_res),
        out_shape=jax.ShapeDtypeStruct((N, hw, C), x.dtype),
        grid=(N,),
        in_specs=in_specs,
        out_specs=pl.BlockSpec((1, hw, C), lambda n: (n, 0, 0)),
        compiler_params=pltpu.CompilerParams(
            dimension_semantics=("parallel",)),
    )(*operands)
    return out.reshape(N, H, W, C)


@partial(jax.jit, static_argnames=("num_groups", "relu", "eps", "thw"))
def _gn_tiled(x, residual, gamma, beta, *, num_groups, relu, eps, thw):
    N, H, W, C = x.shape
    G, Cg, hw = num_groups, C // num_groups, H * W
    nt = hw // thw
    xr = x.reshape(N, hw, C)
    m, mt = _onehot_group_mats(C, G)
    gr = gamma.reshape(1, C).astype(jnp.float32)
    br = beta.reshape(1, C).astype(jnp.float32)
    # Pass 1: per-image, per-channel mean / rstd (accumulated over HW tiles).
    mean, inv = pl.pallas_call(
        partial(_gn_stats_kernel, eps=eps, cg=Cg, hw=hw),
        out_shape=(jax.ShapeDtypeStruct((N, 1, C), jnp.float32),
                   jax.ShapeDtypeStruct((N, 1, C), jnp.float32)),
        grid=(N, nt),
        in_specs=[pl.BlockSpec((1, thw, C), lambda n, t: (n, t, 0)),
                  pl.BlockSpec((C, G), lambda n, t: (0, 0)),
                  pl.BlockSpec((G, C), lambda n, t: (0, 0))],
        out_specs=(pl.BlockSpec((1, 1, C), lambda n, t: (n, 0, 0)),
                   pl.BlockSpec((1, 1, C), lambda n, t: (n, 0, 0))),
        scratch_shapes=[pltpu.VMEM((1, C), jnp.float32),
                        pltpu.VMEM((1, C), jnp.float32)],
        compiler_params=pltpu.CompilerParams(
            dimension_semantics=("parallel", "arbitrary")),
    )(xr, m, mt)
    # Pass 2: tiled normalize (+ optional residual / relu fusion).
    has_res = residual is not None
    operands = [xr]
    in_specs = [pl.BlockSpec((1, thw, C), lambda n, t: (n, t, 0))]
    if has_res:
        operands.append(residual.reshape(N, hw, C))
        in_specs.append(pl.BlockSpec((1, thw, C), lambda n, t: (n, t, 0)))
    operands += [mean, inv, gr, br]
    in_specs += [pl.BlockSpec((1, 1, C), lambda n, t: (n, 0, 0)),
                 pl.BlockSpec((1, 1, C), lambda n, t: (n, 0, 0)),
                 pl.BlockSpec((1, C), lambda n, t: (0, 0)),
                 pl.BlockSpec((1, C), lambda n, t: (0, 0))]
    out = pl.pallas_call(
        partial(_gn_norm_kernel, relu=relu, has_res=has_res),
        out_shape=jax.ShapeDtypeStruct((N, hw, C), x.dtype),
        grid=(N, nt),
        in_specs=in_specs,
        out_specs=pl.BlockSpec((1, thw, C), lambda n, t: (n, t, 0)),
        compiler_params=pltpu.CompilerParams(
            dimension_semantics=("parallel", "parallel")),
    )(*operands)
    return out.reshape(N, H, W, C)


def _hw_tile(hw, c, itembytes=2, budget=4 * 1024 * 1024):
    cap = max(8, budget // max(c * itembytes, 1))
    if hw <= cap:
        return hw
    for d in range(int(cap), 7, -1):
        if hw % d == 0 and d % 8 == 0:
            return d
    return hw  # TODO(synk): ragged HW fallback keeps the whole row block.


def groupnorm(x, gamma, beta, *, num_groups=16, relu=False, residual=None,
              eps=1e-5, force_tiled=False, tile_hw=None):
    """GroupNorm over NHWC x; optional fused residual add + ReLU."""
    N, H, W, C = x.shape
    assert C % num_groups == 0
    hw = H * W
    if (not force_tiled) and hw * C <= _GN_FUSED_MAX_ELEMS:
        return _gn_fused(x, residual, gamma, beta,
                         num_groups=num_groups, relu=relu, eps=eps)
    thw = tile_hw if tile_hw is not None else _hw_tile(hw, C,
                                                       x.dtype.itemsize)
    assert hw % thw == 0
    return _gn_tiled(x, residual, gamma, beta,
                     num_groups=num_groups, relu=relu, eps=eps, thw=thw)


# ----------------------------------------------------------------------------
# Pooling kernels (row-tiled, lane-dense C on lanes)
# ----------------------------------------------------------------------------


def _row_block(rows, row_bytes, budget=8 * 1024 * 1024):
    cap = max(8, budget // max(row_bytes, 1))
    b = 2048
    while b > cap:
        b //= 2
    while b >= 8:
        if rows % b == 0:
            return b
        b //= 2
    return rows


def _max9_kernel(x_ref, o_ref):
    # f32 compare path (v5e VPU has no bf16 ALUs).
    o_ref[...] = jnp.max(x_ref[...].astype(jnp.float32),
                         axis=0).astype(o_ref.dtype)


@jax.jit
def maxpool_3x3_s2_p1(x):
    N, H, W, C = x.shape
    Ho = (H + 2 - 3) // 2 + 1
    Wo = (W + 2 - 3) // 2 + 1
    xp = jnp.pad(x, ((0, 0), (1, 1), (1, 1), (0, 0)),
                 constant_values=-jnp.inf)
    wins = []
    for i in range(3):
        for j in range(3):
            wins.append(xp[:, i:i + 2 * (Ho - 1) + 1:2,
                           j:j + 2 * (Wo - 1) + 1:2, :])
    R = N * Ho * Wo
    s = jnp.stack(wins, axis=0).reshape(9, R, C)
    rb = _row_block(R, 9 * C * x.dtype.itemsize)
    out = pl.pallas_call(
        _max9_kernel,
        out_shape=jax.ShapeDtypeStruct((R, C), x.dtype),
        grid=(R // rb,),
        in_specs=[pl.BlockSpec((9, rb, C), lambda i: (0, i, 0))],
        out_specs=pl.BlockSpec((rb, C), lambda i: (i, 0)),
        compiler_params=pltpu.CompilerParams(
            dimension_semantics=("parallel",)),
    )(s)
    return out.reshape(N, Ho, Wo, C)


def _gap_kernel(x_ref, o_ref, acc_ref, *, hw):
    t = pl.program_id(1)

    @pl.when(t == 0)
    def _():
        acc_ref[...] = jnp.zeros_like(acc_ref)

    acc_ref[...] += jnp.sum(x_ref[0].astype(jnp.float32), axis=0,
                            keepdims=True)

    @pl.when(t == pl.num_programs(1) - 1)
    def _():
        o_ref[0] = (acc_ref[...] * (1.0 / hw)).astype(o_ref.dtype)


@partial(jax.jit, static_argnames=("thw",))
def _gap_impl(xr, *, thw):
    N, hw, C = xr.shape
    return pl.pallas_call(
        partial(_gap_kernel, hw=hw),
        out_shape=jax.ShapeDtypeStruct((N, 1, C), xr.dtype),
        grid=(N, hw // thw),
        in_specs=[pl.BlockSpec((1, thw, C), lambda n, t: (n, t, 0))],
        out_specs=pl.BlockSpec((1, 1, C), lambda n, t: (n, 0, 0)),
        scratch_shapes=[pltpu.VMEM((1, C), jnp.float32)],
        compiler_params=pltpu.CompilerParams(
            dimension_semantics=("parallel", "arbitrary")),
    )(xr)


def global_avg_pool(x):
    N, H, W, C = x.shape
    thw = _hw_tile(H * W, C, x.dtype.itemsize, budget=2 * 1024 * 1024)
    return _gap_impl(x.reshape(N, H * W, C), thw=thw).reshape(N, 1, 1, C)


# ----------------------------------------------------------------------------
# Conv2d (NHWC; 1x1 = direct matmul, KxK = bf16 channel-last patches) + resize
# ----------------------------------------------------------------------------


@partial(jax.jit, static_argnames=("kh", "kw", "stride", "padding", "dilation"))
def _conv2d_impl(x, wm, *, kh, kw, stride, padding, dilation):
    N, H, W, Cin = x.shape
    Cout = wm.shape[1]
    Ho = (H + 2 * padding - dilation * (kh - 1) - 1) // stride + 1
    Wo = (W + 2 * padding - dilation * (kw - 1) - 1) // stride + 1
    if kh == 1 and kw == 1 and padding == 0:
        xs = x[:, ::stride, ::stride, :] if stride != 1 else x
        a = xs.reshape(N * Ho * Wo, Cin)
    else:
        # TODO(synk): fold taps into the matmul K grid axis instead of this
        # bf16 patch materialization (dominant remaining HBM traffic for the
        # dilated ASPP / bottleneck 3x3 convs).
        xp = jnp.pad(x, ((0, 0), (padding, padding),
                         (padding, padding), (0, 0)))
        cols = []
        for i in range(kh):
            for j in range(kw):
                cols.append(
                    xp[:, i * dilation:i * dilation + (Ho - 1) * stride + 1:stride,
                       j * dilation:j * dilation + (Wo - 1) * stride + 1:stride, :])
        a = jnp.concatenate(cols, axis=-1).reshape(N * Ho * Wo, kh * kw * Cin)
    out = matmul(a, wm)                                   # Pallas MXU matmul
    return out.reshape(N, Ho, Wo, Cout)


def conv2d(x, wd, *, stride=1, padding=0, dilation=1):
    return _conv2d_impl(x, wd["w"], kh=wd["kh"], kw=wd["kw"],
                        stride=stride, padding=padding, dilation=dilation)


def _interp_matrix(out_size, in_size):
    m = np.zeros((out_size, in_size), dtype=np.float32)
    if in_size == 1:
        m[:, 0] = 1.0
        return m
    if out_size == 1:
        m[0, 0] = 1.0
        return m
    scale = (in_size - 1) / (out_size - 1)      # align_corners=True
    for i in range(out_size):
        src = i * scale
        lo = int(math.floor(src))
        hi = min(lo + 1, in_size - 1)
        frac = src - lo
        m[i, lo] += 1.0 - frac
        m[i, hi] += frac
    return m


@partial(jax.jit, static_argnames=("out_h", "out_w"))
def bilinear_resize(x, *, out_h, out_w):
    """F.interpolate(mode='bilinear', align_corners=True); x NHWC."""
    N, H, W, C = x.shape
    if H == 1 and W == 1:
        return jnp.broadcast_to(x, (N, out_h, out_w, C))
    A = jnp.asarray(_interp_matrix(out_h, H))
    B = jnp.asarray(_interp_matrix(out_w, W))
    # Contractions are over tiny H/W: matmul uses full-extent K blocks (no pad).
    t = x.transpose(0, 2, 3, 1).reshape(N * W * C, H)
    t = matmul(t, A.T).reshape(N, W, C, out_h)
    t = t.transpose(0, 2, 3, 1).reshape(N * C * out_h, W)
    t = matmul(t, B.T).reshape(N, C, out_h, out_w)
    return t.transpose(0, 2, 3, 1)


# ----------------------------------------------------------------------------
# Deterministic parameters (PyTorch init semantics, matmul-ready bf16 weights)
# ----------------------------------------------------------------------------


def _prep_conv(w):
    cout, cin, kh, kw = w.shape
    if kh == 1 and kw == 1:
        wm = jnp.transpose(w.reshape(cout, cin))
    else:
        wm = jnp.transpose(w, (2, 3, 1, 0)).reshape(kh * kw * cin, cout)
    return {"w": wm.astype(jnp.bfloat16), "kh": kh, "kw": kw}


class ParamGen:
    def __init__(self, seed=0):
        self._key = jax.random.PRNGKey(seed)
        self._n = 0

    def convp(self, cout, cin, kh, kw):
        self._n += 1
        k = jax.random.fold_in(self._key, self._n)
        std = math.sqrt(2.0 / (cin * kh * kw))            # kaiming_normal_
        w = jax.random.normal(k, (cout, cin, kh, kw), jnp.float32) * std
        return _prep_conv(w)

    def gn(self, c):                                       # weight=1, bias=0
        return (jnp.ones((c,), jnp.float32), jnp.zeros((c,), jnp.float32))


def build_bottleneck(pg, inplanes, planes, stride, rate, downsample):
    blk = {
        "stride": stride, "rate": rate, "downsample": downsample,
        "conv1": pg.convp(planes, inplanes, 1, 1), "gn1": pg.gn(planes),
        "conv2": pg.convp(planes, planes, 3, 3),   "gn2": pg.gn(planes),
        "conv3": pg.convp(planes * 4, planes, 1, 1), "gn3": pg.gn(planes * 4),
    }
    if downsample:
        blk["ds_conv"] = pg.convp(planes * 4, inplanes, 1, 1)
        blk["ds_gn"] = pg.gn(planes * 4)
    return blk


def build_resnet101(pg, n_in=3, os=16):
    assert os == 16
    strides, rates, mg = [1, 2, 2, 1], [1, 1, 1, 2], [1, 2, 4]
    layers_cfg = [3, 4, 23, 3]
    P = {"conv1": pg.convp(64, n_in, 7, 7), "gn1": pg.gn(64)}
    inplanes = 64

    def make_layer(planes, blocks, stride, rate):
        nonlocal inplanes
        layer = []
        ds = (stride != 1 or inplanes != planes * 4)
        layer.append(build_bottleneck(pg, inplanes, planes, stride, rate, ds))
        inplanes = planes * 4
        for _ in range(1, blocks):
            layer.append(build_bottleneck(pg, inplanes, planes, 1, 1, False))
        return layer

    def make_mg(planes, blocks, stride, rate):
        nonlocal inplanes
        layer = []
        ds = (stride != 1 or inplanes != planes * 4)
        layer.append(build_bottleneck(pg, inplanes, planes, stride,
                                      blocks[0] * rate, ds))
        inplanes = planes * 4
        for i in range(1, len(blocks)):
            layer.append(build_bottleneck(pg, inplanes, planes, 1,
                                          blocks[i] * rate, False))
        return layer

    P["layer1"] = make_layer(64, layers_cfg[0], strides[0], rates[0])
    P["layer2"] = make_layer(128, layers_cfg[1], strides[1], rates[1])
    P["layer3"] = make_layer(256, layers_cfg[2], strides[2], rates[2])
    P["layer4"] = make_mg(512, mg, strides[3], rates[3])
    return P


def build_deeplab(pg, n_in=3, os=16):
    P = {"resnet": build_resnet101(pg, n_in, os)}
    for i, r in enumerate([1, 6, 12, 18], 1):
        ks = 1 if r == 1 else 3
        P[f"aspp{i}"] = {"conv": pg.convp(256, 2048, ks, ks),
                         "gn": pg.gn(256), "rate": r}
    P["gap_conv"] = pg.convp(256, 2048, 1, 1)
    P["gap_gn"] = pg.gn(256)
    P["conv1"] = pg.convp(256, 1280, 1, 1)
    P["gn1"] = pg.gn(256)
    P["conv2"] = pg.convp(48, 256, 1, 1)
    P["gn2"] = pg.gn(48)
    return P


# ----------------------------------------------------------------------------
# Forward pass (bf16 NHWC internally, f32 NCHW at module boundaries)
# ----------------------------------------------------------------------------


def bottleneck_forward(x, blk):
    s, r = blk["stride"], blk["rate"]
    out = conv2d(x, blk["conv1"])
    out = groupnorm(out, *blk["gn1"], relu=True)
    out = conv2d(out, blk["conv2"], stride=s, padding=r, dilation=r)
    out = groupnorm(out, *blk["gn2"], relu=True)
    out = conv2d(out, blk["conv3"])
    if blk["downsample"]:
        res = conv2d(x, blk["ds_conv"], stride=s)
        res = groupnorm(res, *blk["ds_gn"], relu=False)
    else:
        res = x
    # gn3 + residual add + ReLU fused in one Pallas pass.
    return groupnorm(out, *blk["gn3"], relu=True, residual=res)


def resnet_forward(x, P):
    x = conv2d(x, P["conv1"], stride=2, padding=3)
    x = groupnorm(x, *P["gn1"], relu=True)
    x = maxpool_3x3_s2_p1(x)
    for blk in P["layer1"]:
        x = bottleneck_forward(x, blk)
    low_level_feat = x
    for blk in P["layer2"]:
        x = bottleneck_forward(x, blk)
    for blk in P["layer3"]:
        x = bottleneck_forward(x, blk)
    for blk in P["layer4"]:
        x = bottleneck_forward(x, blk)
    return x, low_level_feat


def aspp_forward(x, p):
    r = p["rate"]
    if r == 1:
        y = conv2d(x, p["conv"])
    else:
        y = conv2d(x, p["conv"], stride=1, padding=r, dilation=r)
    return groupnorm(y, *p["gn"], relu=True)


def deeplab_forward(inp_nchw, P):
    x = jnp.transpose(inp_nchw, (0, 2, 3, 1)).astype(jnp.bfloat16)
    x, low = resnet_forward(x, P["resnet"])
    x1 = aspp_forward(x, P["aspp1"])
    x2 = aspp_forward(x, P["aspp2"])
    x3 = aspp_forward(x, P["aspp3"])
    x4 = aspp_forward(x, P["aspp4"])
    x5 = global_avg_pool(x)
    x5 = conv2d(x5, P["gap_conv"])
    x5 = groupnorm(x5, *P["gap_gn"], relu=True)
    x5 = bilinear_resize(x5, out_h=x4.shape[1], out_w=x4.shape[2])
    x = jnp.concatenate([x1, x2, x3, x4, x5], axis=-1)    # (N, h, w, 1280)
    x = conv2d(x, P["conv1"])
    x = groupnorm(x, *P["gn1"], relu=False)
    x = bilinear_resize(x, out_h=low.shape[1], out_w=low.shape[2])
    low = conv2d(low, P["conv2"])
    low = groupnorm(low, *P["gn2"], relu=False)
    out = jnp.concatenate([x, low], axis=-1)              # (N, H/4, W/4, 304)
    return jnp.transpose(out, (0, 3, 1, 2)).astype(jnp.float32)


# ----------------------------------------------------------------------------

if __name__ == "__main__":
    key = jax.random.PRNGKey(0)
    x = jax.random.normal(key, (2, 3, 32, 32), jnp.float32)   # NCHW input

    pg = ParamGen(seed=0)
    params = build_deeplab(pg, n_in=3, os=16)

    out = deeplab_forward(x, params)
    out = jax.block_until_ready(out)

    assert out.shape == (2, 256 + 48, 8, 8), out.shape
    assert bool(jnp.all(jnp.isfinite(out)))

    # Exercise + verify the spatially tiled GroupNorm path (not hit above at
    # these small shapes) against the fused single-block path.
    k2 = jax.random.PRNGKey(1)
    tx = jax.random.normal(k2, (2, 8, 8, 64), jnp.float32).astype(jnp.bfloat16)
    tr = jax.random.normal(jax.random.fold_in(k2, 7),
                           (2, 8, 8, 64), jnp.float32).astype(jnp.bfloat16)
    tg = 1.0 + 0.1 * jax.random.normal(jax.random.fold_in(k2, 8), (64,),
                                       jnp.float32)
    tb = 0.1 * jax.random.normal(jax.random.fold_in(k2, 9), (64,), jnp.float32)
    y_f = groupnorm(tx, tg, tb, relu=True, residual=tr)
    y_t = groupnorm(tx, tg, tb, relu=True, residual=tr,
                    force_tiled=True, tile_hw=16)
    y_f = jax.block_until_ready(y_f)
    y_t = jax.block_until_ready(y_t)
    assert jnp.allclose(y_f.astype(jnp.float32), y_t.astype(jnp.float32),
                        atol=5e-2, rtol=5e-2)

    print("KERNEL_OK")
</pallas_src>

<mosaic_0001>
module attributes {stable_mosaic.version = 11 : i64} {
  func.func @_matmul_kernel(%arg0: i32, %arg1: i32, %arg2: i32, %arg3: memref<256x147xbf16, #tpu.memory_space<vmem>>, %arg4: memref<147x64xbf16, #tpu.memory_space<vmem>>, %arg5: memref<256x64xbf16, #tpu.memory_space<vmem>>, %arg6: memref<256x64xf32, #tpu.memory_space<vmem>>) attributes {dimension_semantics = [#tpu.dimension_semantics<parallel>, #tpu.dimension_semantics<parallel>, #tpu.dimension_semantics<arbitrary>], iteration_bounds = array<i64: 2, 1, 1>, scalar_prefetch = 0 : i64, scratch_operands = 1 : i64, tpu.core_type = #tpu.core_type<tc>, window_params = [{transform_indices = @transform_0, window_bounds = array<i64: 256, 147>}, {transform_indices = @transform_1, window_bounds = array<i64: 147, 64>}, {transform_indices = @transform_2, window_bounds = array<i64: 256, 64>}]} {
    %c0_i32 = arith.constant 0 : i32
    %0 = arith.cmpi eq, %arg2, %c0_i32 : i32
    %1 = arith.extui %0 : i1 to i32
    %c0_i32_0 = arith.constant 0 : i32
    %2 = arith.cmpi ne, %1, %c0_i32_0 : i32
    scf.if %2 {
      %cst_10 = arith.constant 0.000000e+00 : f32
      %12 = vector.broadcast %cst_10 : f32 to vector<256x64xf32>
      %c0_11 = arith.constant 0 : index
      %c0_12 = arith.constant 0 : index
      %13 = vector.load %arg6[%c0_11, %c0_12] : memref<256x64xf32, #tpu.memory_space<vmem>>, vector<256x64xf32>
      tpu.vector_store %arg6[%c0_11, %c0_12], %12 {strides = array<i32>} : memref<256x64xf32, #tpu.memory_space<vmem>>, vector<256x64xf32>,
    } else {
    }
    %c0 = arith.constant 0 : index
    %c0_1 = arith.constant 0 : index
    %3 = vector.load %arg6[%c0, %c0_1] : memref<256x64xf32, #tpu.memory_space<vmem>>, vector<256x64xf32>
    %c0_2 = arith.constant 0 : index
    %c0_3 = arith.constant 0 : index
    %4 = vector.load %arg3[%c0_2, %c0_3] : memref<256x147xbf16, #tpu.memory_space<vmem>>, vector<256x147xbf16>
    %c0_4 = arith.constant 0 : index
    %c0_5 = arith.constant 0 : index
    %5 = vector.load %arg4[%c0_4, %c0_5] : memref<147x64xbf16, #tpu.memory_space<vmem>>, vector<147x64xbf16>
    %cst = arith.constant dense<0.000000e+00> : vector<256x64xf32>
    %6 = tpu.matmul %4, %5, %cst {dimension_numbers = #tpu.dot_dimension_numbers<[1], [0], [0], [1], [0, 0, 1, 1], [], []>} : vector<256x147xbf16>, vector<147x64xbf16>, vector<256x64xf32> -> vector<256x64xf32>
    %7 = arith.addf %3, %6 : vector<256x64xf32>
    %c0_6 = arith.constant 0 : index
    %c0_7 = arith.constant 0 : index
    %8 = vector.load %arg6[%c0_6, %c0_7] : memref<256x64xf32, #tpu.memory_space<vmem>>, vector<256x64xf32>
    tpu.vector_store %arg6[%c0_6, %c0_7], %7 {strides = array<i32>} : memref<256x64xf32, #tpu.memory_space<vmem>>, vector<256x64xf32>,
    %c0_i32_8 = arith.constant 0 : i32
    %9 = arith.cmpi eq, %arg2, %c0_i32_8 : i32
    %10 = arith.extui %9 : i1 to i32
    %c0_i32_9 = arith.constant 0 : i32
    %11 = arith.cmpi ne, %10, %c0_i32_9 : i32
    scf.if %11 {
      %c0_10 = arith.constant 0 : index
      %c0_11 = arith.constant 0 : index
      %12 = vector.load %arg6[%c0_10, %c0_11] : memref<256x64xf32, #tpu.memory_space<vmem>>, vector<256x64xf32>
      %13 = arith.truncf %12 : vector<256x64xf32> to vector<256x64xbf16>
      %c0_12 = arith.constant 0 : index
      %c0_13 = arith.constant 0 : index
      %14 = vector.load %arg5[%c0_12, %c0_13] : memref<256x64xbf16, #tpu.memory_space<vmem>>, vector<256x64xbf16>
      tpu.vector_store %arg5[%c0_12, %c0_13], %13 {strides = array<i32>} : memref<256x64xbf16, #tpu.memory_space<vmem>>, vector<256x64xbf16>,
    } else {
    }
    return
  }
  func.func @transform_0(%arg0: i32, %arg1: i32, %arg2: i32) -> (i32, i32) {
    %c0_i32 = arith.constant 0 : i32
    return %arg0, %arg2 : i32, i32
  }
  func.func @transform_1(%arg0: i32, %arg1: i32, %arg2: i32) -> (i32, i32) {
    %c0_i32 = arith.constant 0 : i32
    return %arg2, %arg1 : i32, i32
  }
  func.func @transform_2(%arg0: i32, %arg1: i32, %arg2: i32) -> (i32, i32) {
    %c0_i32 = arith.constant 0 : i32
    return %arg0, %arg1 : i32, i32
  }
}

</mosaic_0001>

<bundles_post_ra>
// kernel: _conv2d_impl.1
= control target key start
LH: loop header
LB: loop body
LE: loop exit
PB: predicated region body
PF: predicated region fallthrough
CT: control target
= control target key end

     0   :  { %7 = vsyncpa [#allocation4], 0  ;;  %s1864_s0 = inlined_call_operand.vmem [shape: bf16[512,147], index: 0, kind: input, shape index: {}]   ;;  %s1865_s1 = inlined_call_operand.vmem [shape: bf16[147,64], index: 1, kind: input, shape index: {}]   ;;  %s1866_s2 = inlined_call_operand.hbm [shape: bf16[512,64], index: 2, kind: output, shape index: {}]  }
   0x1   :  { %9 = vsyncpa [#allocation4 + $0x1], 0  ;;  %s1510_s9 = smov 0   ;;  %s1512_s10 = smov 0  }
   0x2   :  { %s1514_s11 = smov 0   ;;  %s1516_s12 = smov 0  }
   0x3   :  { %s1518_s13 = smov 0   ;;  %s1520_s14 = smov 0  }
   0x4 LB: > { %s1132_s15 = sadd.s32 4294967295, %s1487_s14   ;;  %s1133_s16 = sadd.s32 4294967294, %s1487_s14   ;;  %s1487_s14 = sphi %s1520_s14, %s15_s14   ;;  %s1483_s13 = sphi %s1518_s13, %s1873_s13   ;;  %s1479_s12 = sphi %s1516_s12, %s1872_s12   ;;  %s1475_s11 = sphi %s1514_s11, %s1871_s11   ;;  %s1471_s10 = sphi %s1512_s10, %s1870_s10   ;;  %s1467_s9 = sphi %s1510_s9, %s1869_s9  }
   0x5   : > { %s34_s17 = sadd.s32 1, %s1483_s13  ;;  %s99_s18 = sadd.s32 1, %s1475_s11 }
   0x6   : > { %p36_p0 = scmp.ge.s32.totalorder %s34_s17, 2  ;;  %p109_p1 = scmp.ne.s32.totalorder %s1475_s11, %s1471_s10 }
   0x7   : > { %p110_p2 = scmp.eq.s32.totalorder %s1132_s15, 1  ;;  %p115_p3 = scmp.ne.s32.totalorder %s1471_s10, %s1467_s9 }
   0x8   : > { %s1875_s17 = smov (%p36_p0, %s34_s17), 0  ;;  %p116_p5 = scmp.eq.s32.totalorder %s1133_s16, 1 }
   0x9   : > { %p1550_p4 = por %p110_p2, %p109_p1  ;;  %s94_s20 = ssub.s32 %s1483_s13, %s1875_s17 }
   0xa   : > { %p1137_p6 = scmp.ge.s32.totalorder %s1487_s14, 1  ;;  %p97_p7 = scmp.eq.s32.totalorder %s94_s20, 0 }
   0xb   : > { %p1557_p8 = por %p116_p5, %p115_p3  ;;  %p161_p9 = scmp.lt.s32.totalorder %s1487_s14, 3 }
   0xc   : > { %s1563_s22 = scalar_select %p97_p7, %s1475_s11, %s99_s18  }
   0xd   : > { %p162_p10 = pnand %p1137_p6, %p161_p9 }
   0xe   : > { %v1351_v0 = vld [vmem:[%s1865_s1] sm:$0xff] (!%p162_p10)   ;;  %v1489_v1 = vmov (!%p162_p10), 0   ;;  %v1352_v2 = vld [vmem:[%s1865_s1 + $0x8] sm:$0xff] (!%p162_p10)   ;;  %v1353_v3 = vld [vmem:[%s1865_s1 + $0x10] sm:$0xff] (!%p162_p10)   ;;  %s1139_s29 = sshll.u32 (!%p162_p10), %s1479_s12, 5  ;;  %vm223_vm0 = vcmask (!%p162_p10), 523264  }
   0xf   : > { %165 = sbr.rel (%p162_p10) target bundleno = 355 (0x163), region = 28  ;;  %596 = vmatprep.subr.bf16.mxu0 (!%p162_p10), %v1489_v1  ;;  %1271 = vmatprep.subr.bf16.mxu1 (!%p162_p10), %v1489_v1  ;;  %p198_p11 = scmp.lt.s32.totalorder (!%p162_p10), %s1139_s29, 63  ;;  %v1354_v4 = vld [vmem:[%s1865_s1 + $0x18] sm:$0xff] (!%p162_p10)   ;;  %v1490_v5 = vmov (!%p162_p10), 0.0   ;;  %v1355_v6 = vld [vmem:[%s1865_s1 + $0x20] sm:$0xff] (!%p162_p10)   ;;  %vm540_vm1 = vcmask (!%p162_p10), 154624  }
  0x10   : > { %597 = vmatpush1.bf16.msra.mxu0 (!%p162_p10), %v1351_v0  ;;  %1281 = vmatpush1.bf16.msra.mxu1 (!%p162_p10), %v1351_v0  ;;  %224 = vst.msk [vmem:[#allocation2] sm:$0xff] (!%p162_p10), %vm223_vm0, %v1490_v5  ;;  %225 = vst.msk [vmem:[#allocation2 + $0x8] sm:$0xff] (!%p162_p10), %vm223_vm0, %v1490_v5  ;;  %v1356_v9 = vld [vmem:[%s1865_s1 + $0x28] sm:$0xff] (!%p162_p10)   ;;  %v1357_v10 = vld [vmem:[%s1865_s1 + $0x30] sm:$0xff] (!%p162_p10)   ;;  %vm589_vm2 = vcmask (!%p162_p10), 1040384   ;;  %vm590_vm3 = vcmask (!%p162_p10), 1041408  }
  0x11   : > { %598 = vmatprep.subr.bf16.mxu0 (!%p162_p10), %v1489_v1  ;;  %1272 = vmatprep.subr.bf16.mxu1 (!%p162_p10), %v1489_v1  ;;  %226 = vst.msk [vmem:[#allocation2 + $0x10] sm:$0xff] (!%p162_p10), %vm223_vm0, %v1490_v5  ;;  %227 = vst.msk [vmem:[#allocation2 + $0x18] sm:$0xff] (!%p162_p10), %vm223_vm0, %v1490_v5  ;;  %v1358_v11 = vld [vmem:[%s1865_s1 + $0x38] sm:$0xff] (!%p162_p10)   ;;  %v1491_v12 = vmov (!%p162_p10), 65535   ;;  %v1359_v14 = vld [vmem:[%s1865_s1 + $0x40] sm:$0xff] (!%p162_p10)   ;;  %s193_s30 = sand.u32 (!%p162_p10), 1, %s1471_s10  }
  0x12   : > { %228 = vst.msk [vmem:[#allocation2 + $0x20] sm:$0xff] (!%p162_p10), %vm223_vm0, %v1490_v5  ;;  %229 = vst.msk [vmem:[#allocation2 + $0x28] sm:$0xff] (!%p162_p10), %vm223_vm0, %v1490_v5  ;;  %v591_v13 = vsel (!%p162_p10), %vm589_vm2, 4294967295, %v1491_v12  ;;  %v1360_v15 = vld [vmem:[%s1865_s1 + $0x48] ss:$0 sps:$4 sm:$0x33] (!%p162_p10)  }
  0x13   : > { %230 = vst.msk [vmem:[#allocation2 + $0x30] sm:$0xff] (!%p162_p10), %vm223_vm0, %v1490_v5  ;;  %231 = vst.msk [vmem:[#allocation2 + $0x38] sm:$0xff] (!%p162_p10), %vm223_vm0, %v1490_v5  ;;  %v592_v16 = vsel (!%p162_p10), %vm590_vm3, %v591_v13, 0  ;;  %s1138_s3 = sshll.u32 (!%p162_p10), %s193_s30, 7  ;;  %vm985_vm4 = vcmask (!%p162_p10), 519168   ;;  %s1270_s5 = sshll.u32 (!%p162_p10), %s1479_s12, 11 }
  0x14   : > { %599 = vmatpush1.bf16.msra.mxu0 (!%p162_p10), %v1352_v2  ;;  %1282 = vmatpush1.bf16.msra.mxu1 (!%p162_p10), %v1352_v2  ;;  %232 = vst.msk [vmem:[#allocation2 + $0x40] sm:$0xff] (!%p162_p10), %vm223_vm0, %v1490_v5  ;;  %233 = vst.msk [vmem:[#allocation2 + $0x48] sm:$0xff] (!%p162_p10), %vm223_vm0, %v1490_v5  ;;  %v594_v17 = vand.u32 (!%p162_p10), %v1360_v15, %v592_v16  ;;  %s1804_s15 = scalar_lea.hbm (!%p162_p10), %s1866_s2, %s1270_s5  ;;  %s1818_s12 = scalar_lea.sflag (!%p162_p10), [#allocation4], %s193_s30 }
  0x15   : > { %600 = vmatprep.subr.bf16.mxu0 (!%p162_p10), %v1489_v1  ;;  %1273 = vmatprep.subr.bf16.mxu1 (!%p162_p10), %v1489_v1  ;;  %234 = vst.msk [vmem:[#allocation2 + $0x50] sm:$0xff] (!%p162_p10), %vm223_vm0, %v1490_v5  ;;  %235 = vst.msk [vmem:[#allocation2 + $0x58] sm:$0xff] (!%p162_p10), %vm223_vm0, %v1490_v5  ;;  %s1492_s18 = smov (!%p162_p10), [#allocation3]  }
  0x16   : > { %s1877_s29 = smov (!%p198_p11, %s1139_s29), 63  ;;  %236 = vst.msk [vmem:[#allocation2 + $0x60] sm:$0xff] %vm223_vm0, %v1490_v5  ;;  %237 = vst.msk [vmem:[#allocation2 + $0x68] sm:$0xff] %vm223_vm0, %v1490_v5  ;;  %s1413_s20 = sshll.u32 %s1492_s18, 4  ;;  %s1414_s20 = int_to_ptr.vmem [resolvable:$false] %s1413_s20 }
  0x17   : > { %s1237_s4 = sshll.u32 %s1877_s29, 3  ;;  %238 = vst.msk [vmem:[#allocation2 + $0x70] sm:$0xff] %vm223_vm0, %v1490_v5  ;;  %239 = vst.msk [vmem:[#allocation2 + $0x78] sm:$0xff] %vm223_vm0, %v1490_v5  ;;  %v256_v48 = vld [vmem:[#allocation2] sm:$0xff]  ;;  %v257_v52 = vld [vmem:[#allocation2 + $0x8] sm:$0xff]  ;;  %s1415_s23 = scalar_lea.vmem %s1414_s20, 4096 }
  0x18   : > { %601 = vmatpush1.bf16.msra.mxu0 %v1353_v3  ;;  %1283 = vmatpush1.bf16.msra.mxu1 %v1353_v3  ;;  %240 = vst.msk [vmem:[#allocation2 + $0x80] sm:$0xff] %vm223_vm0, %v1490_v5  ;;  %241 = vst.msk [vmem:[#allocation2 + $0x88] sm:$0xff] %vm223_vm0, %v1490_v5  ;;  %s1626_s7 = scalar_lea.vmem %s1864_s0, %s1237_s4  ;;  %v258_v0 = vld [vmem:[#allocation2 + $0x10] sm:$0xff]  ;;  %s1715_s4 = scalar_lea.vmem [#allocation3], %s1138_s3 }
  0x19   : > { %602 = vmatprep.subr.bf16.mxu0 %v1489_v1  ;;  %1274 = vmatprep.subr.bf16.mxu1 %v1489_v1  ;;  %242 = vst.msk [vmem:[#allocation2 + $0x90] sm:$0xff] %vm223_vm0, %v1490_v5  ;;  %243 = vst.msk [vmem:[#allocation2 + $0x98] sm:$0xff] %vm223_vm0, %v1490_v5  ;;  %v1363_v7 = vld [vmem:[%s1626_s7 + $0x4] ss:$8 sps:$4 sm:$0xff]   ;;  %v1361_v18 = vld [vmem:[%s1626_s7] ss:$8 sps:$4 sm:$0xff]  }
  0x1a   : > { %244 = vst.msk [vmem:[#allocation2 + $0xa0] sm:$0xff] %vm223_vm0, %v1490_v5  ;;  %245 = vst.msk [vmem:[#allocation2 + $0xa8] sm:$0xff] %vm223_vm0, %v1490_v5  ;;  %v1366_v8 = vld [vmem:[%s1626_s7 + $0x84] ss:$8 sps:$4 sm:$0xff]   ;;  %1184 = vmatprep.mubr.msk.bf16.mxu0 %vm540_vm1, %v1363_v7  ;;  %v1364_v19 = vld [vmem:[%s1626_s7 + $0x80] ss:$8 sps:$4 sm:$0xff]  }
  0x1b   : > { %246 = vst.msk [vmem:[#allocation2 + $0xb0] sm:$0xff] %vm223_vm0, %v1490_v5  ;;  %247 = vst.msk [vmem:[#allocation2 + $0xb8] sm:$0xff] %vm223_vm0, %v1490_v5  ;;  %1192 = vmatprep.mubr.msk.bf16.mxu1 %vm540_vm1, %v1366_v8  ;;  %v1367_v20 = vld [vmem:[%s1626_s7 + $0x14] ss:$8 sps:$4 sm:$0xff]   ;;  %v1371_v22 = vld [vmem:[%s1626_s7 + $0x10] ss:$8 sps:$4 sm:$0xff]  }
  0x1c   : > { %248 = vst.msk [vmem:[#allocation2 + $0xc0] sm:$0xff] %vm223_vm0, %v1490_v5  ;;  %249 = vst.msk [vmem:[#allocation2 + $0xc8] sm:$0xff] %vm223_vm0, %v1490_v5  ;;  %603 = vmatpush1.bf16.msra.mxu0 %v1354_v4  ;;  %1284 = vmatpush1.bf16.msra.mxu1 %v1354_v4  ;;  %v1369_v21 = vld [vmem:[%s1626_s7 + $0x94] ss:$8 sps:$4 sm:$0xff]   ;;  %v1372_v23 = vld [vmem:[%s1626_s7 + $0x90] ss:$8 sps:$4 sm:$0xff]  }
  0x1d   : > { %250 = vst.msk [vmem:[#allocation2 + $0xd0] sm:$0xff] %vm223_vm0, %v1490_v5  ;;  %251 = vst.msk [vmem:[#allocation2 + $0xd8] sm:$0xff] %vm223_vm0, %v1490_v5  ;;  %604 = vmatprep.subr.bf16.mxu0 %v1489_v1  ;;  %1275 = vmatprep.subr.bf16.mxu1 %v1489_v1  ;;  %v1373_v24 = vld [vmem:[%s1626_s7 + $0x24] ss:$8 sps:$4 sm:$0xff]   ;;  %v1377_v26 = vld [vmem:[%s1626_s7 + $0x20] ss:$8 sps:$4 sm:$0xff]  }
  0x1e   : > { %252 = vst.msk [vmem:[#allocation2 + $0xe0] sm:$0xff] %vm223_vm0, %v1490_v5  ;;  %253 = vst.msk [vmem:[#allocation2 + $0xe8] sm:$0xff] %vm223_vm0, %v1490_v5  ;;  %v1375_v25 = vld [vmem:[%s1626_s7 + $0xa4] ss:$8 sps:$4 sm:$0xff]   ;;  %v1378_v27 = vld [vmem:[%s1626_s7 + $0xa0] ss:$8 sps:$4 sm:$0xff]  }
  0x1f   : > { %254 = vst.msk [vmem:[#allocation2 + $0xf0] sm:$0xff] %vm223_vm0, %v1490_v5  ;;  %255 = vst.msk [vmem:[#allocation2 + $0xf8] sm:$0xff] %vm223_vm0, %v1490_v5  ;;  %v1379_v28 = vld [vmem:[%s1626_s7 + $0x34] ss:$8 sps:$4 sm:$0xff]   ;;  %v1383_v30 = vld [vmem:[%s1626_s7 + $0x30] ss:$8 sps:$4 sm:$0xff]  }
  0x20   : > { %605 = vmatpush1.bf16.msra.mxu0 %v1355_v6  ;;  %1285 = vmatpush1.bf16.msra.mxu1 %v1355_v6  ;;  %v1381_v29 = vld [vmem:[%s1626_s7 + $0xb4] ss:$8 sps:$4 sm:$0xff]   ;;  %v1384_v31 = vld [vmem:[%s1626_s7 + $0xb0] ss:$8 sps:$4 sm:$0xff]   ;;  %v1385_v32 = vld [vmem:[%s1626_s7 + $0x44] ss:$8 sps:$4 sm:$0xff]  }
  0x21   : > { %606 = vmatprep.subr.bf16.mxu0 %v1489_v1  ;;  %1276 = vmatprep.subr.bf16.mxu1 %v1489_v1  ;;  %v1387_v33 = vld [vmem:[%s1626_s7 + $0xc4] ss:$8 sps:$4 sm:$0xff]   ;;  %v1389_v34 = vld [vmem:[%s1626_s7 + $0x40] ss:$8 sps:$4 sm:$0xff]   ;;  %v1391_v36 = vld [vmem:[%s1626_s7 + $0x54] ss:$8 sps:$4 sm:$0xff]  }
  0x22   : > { %v1390_v35 = vld [vmem:[%s1626_s7 + $0xc0] ss:$8 sps:$4 sm:$0xff]   ;;  %v1393_v37 = vld [vmem:[%s1626_s7 + $0xd4] ss:$8 sps:$4 sm:$0xff]   ;;  %v1395_v38 = vld [vmem:[%s1626_s7 + $0x50] ss:$8 sps:$4 sm:$0xff]  }
  0x23   : > { %v1396_v39 = vld [vmem:[%s1626_s7 + $0xd0] ss:$8 sps:$4 sm:$0xff]   ;;  %v1397_v40 = vld [vmem:[%s1626_s7 + $0x64] ss:$8 sps:$4 sm:$0xff]   ;;  %v1401_v42 = vld [vmem:[%s1626_s7 + $0x60] ss:$8 sps:$4 sm:$0xff]  }
  0x24   : > { %607 = vmatpush1.bf16.msra.mxu0 %v1356_v9  ;;  %1286 = vmatpush1.bf16.msra.mxu1 %v1356_v9  ;;  %v1399_v41 = vld [vmem:[%s1626_s7 + $0xe4] ss:$8 sps:$4 sm:$0xff]   ;;  %v1402_v43 = vld [vmem:[%s1626_s7 + $0xe0] ss:$8 sps:$4 sm:$0xff]   ;;  %v1403_v44 = vld [vmem:[%s1626_s7 + $0x74] ss:$8 sps:$4 sm:$0xff]  }
  0x25   : > { %608 = vmatprep.subr.bf16.mxu0 %v1489_v1  ;;  %1277 = vmatprep.subr.bf16.mxu1 %v1489_v1  ;;  %v1405_v45 = vld [vmem:[%s1626_s7 + $0xf4] ss:$8 sps:$4 sm:$0xff]   ;;  %v1407_v46 = vld [vmem:[%s1626_s7 + $0x70] ss:$8 sps:$4 sm:$0xff]   ;;  %v272_v49 = vld [vmem:[#allocation2 + $0x80] sm:$0xff]  ;;  %s1033_s6 = sshll.u32 %s1715_s4, 4  ;;  %s1806_s6 = int_to_ptr.vmem [resolvable:$true] %s1033_s6 }
  0x26   : > { %v1408_v47 = vld [vmem:[%s1626_s7 + $0xf0] ss:$8 sps:$4 sm:$0xff]   ;;  %v273_v53 = vld [vmem:[#allocation2 + $0x88] sm:$0xff]  ;;  %s1409_s16 = scalar_lea.vmem %s1806_s6, 2048  ;;  %p1416_p1 = scmp.lt.s32.totalorder %s1806_s6, %s1414_s20 }
  0x27   : > { %v259_v4 = vld [vmem:[#allocation2 + $0x18] sm:$0xff]  ;;  %p1410_p12 = scmp.ne.s32.totalorder %s1806_s6, %s1409_s16  ;;  %p1417_p2 = scmp.lt.s32.totalorder %s1415_s23, %s1409_s16 }
  0x28   : > { %609 = vmatpush1.bf16.msra.mxu0 %v1357_v10  ;;  %1287 = vmatpush1.bf16.msra.mxu1 %v1357_v10  ;;  %v275_v5 = vld [vmem:[#allocation2 + $0x98] sm:$0xff] }
  0x29   : > { %610 = vmatprep.subr.bf16.mxu0 %v1489_v1  ;;  %1278 = vmatprep.subr.bf16.mxu1 %v1489_v1  ;;  %p1411_p13 = pnand %p1410_p12, %p1550_p4  ;;  %p1418_p3 = por %p1417_p2, %p1416_p1 }
  0x2b   : > { %p1412_p0 = pneg %p1411_p13 }
  0x2c   : > { %611 = vmatpush1.bf16.msra.mxu0 %v1358_v11  ;;  %1288 = vmatpush1.bf16.msra.mxu1 %v1358_v11 }
  0x2d   : > { %612 = vmatprep.subr.bf16.mxu0 %v1489_v1  ;;  %1279 = vmatprep.subr.bf16.mxu1 %v1489_v1  ;;  %p1419_p5 = pnand %p1418_p3, %p1412_p0 }
  0x30   : > { %613 = vmatpush1.bf16.msra.mxu0 %v1359_v14  ;;  %1289 = vmatpush1.bf16.msra.mxu1 %v1359_v14 }
  0x31   : > { %614 = vmatprep.subr.bf16.mxu0 %v1489_v1  ;;  %1280 = vmatprep.subr.bf16.mxu1 %v1489_v1  ;;  %v274_v1 = vld [vmem:[#allocation2 + $0x90] sm:$0xff] }
  0x34   : > { %615 = vmatpush1.bf16.msra.mxu0 %v594_v17  ;;  %1290 = vmatpush1.bf16.msra.mxu1 %v594_v17 }
  0x37   : > { %629 = vmatmul.mubr.bf16.vlgmr.msra.gmra.mrb[0].mxu0 %v1361_v18  ;;  %693 = vmatmul.mubr.bf16.vlgmr.msra.gmra.mrb[0].mxu1 %v1364_v19 }
  0x38   : > { %1185 = vmatprep.mubr.msk.bf16.mxu0 %vm540_vm1, %v1367_v20  ;;  %1193 = vmatprep.mubr.msk.bf16.mxu1 %vm540_vm1, %v1369_v21 }
  0x3f   : > { %637 = vmatmul.mubr.bf16.gmra.mrb[4].mxu0 %v1371_v22  ;;  %701 = vmatmul.mubr.bf16.gmra.mrb[4].mxu1 %v1372_v23 }
  0x40   : > { %1186 = vmatprep.mubr.msk.bf16.mxu0 %vm540_vm1, %v1373_v24  ;;  %1194 = vmatprep.mubr.msk.bf16.mxu1 %vm540_vm1, %v1375_v25  ;;  %v260_v24 = vld [vmem:[#allocation2 + $0x20] sm:$0xff] }
  0x41   : > { %v276_v25 = vld [vmem:[#allocation2 + $0xa0] sm:$0xff] }
  0x47   : > { %645 = vmatmul.mubr.bf16.gmra.mrb[8].mxu0 %v1377_v26  ;;  %709 = vmatmul.mubr.bf16.gmra.mrb[8].mxu1 %v1378_v27 }
  0x48   : > { %1187 = vmatprep.mubr.msk.bf16.mxu0 %vm540_vm1, %v1379_v28  ;;  %1195 = vmatprep.mubr.msk.bf16.mxu1 %vm540_vm1, %v1381_v29  ;;  %v261_v28 = vld [vmem:[#allocation2 + $0x28] sm:$0xff] }
  0x49   : > { %v277_v29 = vld [vmem:[#allocation2 + $0xa8] sm:$0xff] }
  0x4f   : > { %653 = vmatmul.mubr.bf16.gmra.mrb[12].mxu0 %v1383_v30  ;;  %717 = vmatmul.mubr.bf16.gmra.mrb[12].mxu1 %v1384_v31 }
  0x50   : > { %1188 = vmatprep.mubr.msk.bf16.mxu0 %vm540_vm1, %v1385_v32  ;;  %1196 = vmatprep.mubr.msk.bf16.mxu1 %vm540_vm1, %v1387_v33 }
  0x57   : > { %661 = vmatmul.mubr.bf16.gmra.mrb[16].mxu0 %v1389_v34  ;;  %725 = vmatmul.mubr.bf16.gmra.mrb[16].mxu1 %v1390_v35 }
  0x58   : > { %1189 = vmatprep.mubr.msk.bf16.mxu0 %vm540_vm1, %v1391_v36  ;;  %1197 = vmatprep.mubr.msk.bf16.mxu1 %vm540_vm1, %v1393_v37 }
  0x5f   : > { %669 = vmatmul.mubr.bf16.gmra.mrb[20].mxu0 %v1395_v38  ;;  %733 = vmatmul.mubr.bf16.gmra.mrb[20].mxu1 %v1396_v39 }
  0x60   : > { %1190 = vmatprep.mubr.msk.bf16.mxu0 %vm540_vm1, %v1397_v40  ;;  %1198 = vmatprep.mubr.msk.bf16.mxu1 %vm540_vm1, %v1399_v41 }
  0x67   : > { %677 = vmatmul.mubr.bf16.gmra.mrb[24].mxu0 %v1401_v42  ;;  %741 = vmatmul.mubr.bf16.gmra.mrb[24].mxu1 %v1402_v43 }
  0x68   : > { %1191 = vmatprep.mubr.msk.bf16.mxu0 %vm540_vm1, %v1403_v44  ;;  %1199 = vmatprep.mubr.msk.bf16.mxu1 %vm540_vm1, %v1405_v45 }
  0x6f   : > { %685 = vmatmul.mubr.bf16.gmra.mrb[28].mxu0 %v1407_v46  ;;  %749 = vmatmul.mubr.bf16.gmra.mrb[28].mxu1 %v1408_v47 }
 0x10a   : > { %v630_v50 = vpop.f32.mrb[0].mxu0  ;;  %v694_v51 = vpop.f32.mrb[0].mxu1 }
 0x10b   : > { %v757_v54 = vadd.f32 %v630_v50, %v256_v48  ;;  %v773_v55 = vadd.f32 %v694_v51, %v272_v49  ;;  %v632_v56 = vpop.f32.mrb[1].mxu0  ;;  %v696_v57 = vpop.f32.mrb[1].mxu1  ;;  %v262_v48 = vld [vmem:[#allocation2 + $0x30] sm:$0xff] }
 0x10c   : > { %v633_v58 = vpop.f32.mrb[2].mxu0  ;;  %v697_v59 = vpop.f32.mrb[2].mxu1  ;;  %v278_v49 = vld [vmem:[#allocation2 + $0xb0] sm:$0xff] }
 0x10d   : > { %790 = vst.msk [vmem:[#allocation2] sm:$0xff] %vm223_vm0, %v757_v54  ;;  %806 = vst.msk [vmem:[#allocation2 + $0x80] sm:$0xff] %vm223_vm0, %v773_v55  ;;  %v758_v60 = vadd.f32 %v633_v58, %v257_v52  ;;  %v774_v61 = vadd.f32 %v697_v59, %v273_v53  ;;  %v635_v62 = vpop.f32.mrb[3].mxu0  ;;  %v699_v63 = vpop.f32.mrb[3].mxu1  ;;  %v263_v52 = vld [vmem:[#allocation2 + $0x38] sm:$0xff] }
 0x10e   : > { %v279_v53 = vld [vmem:[#allocation2 + $0xb8] sm:$0xff] }
 0x10f   : > { %791 = vst.msk [vmem:[#allocation2 + $0x8] sm:$0xff] %vm223_vm0, %v758_v60  ;;  %807 = vst.msk [vmem:[#allocation2 + $0x88] sm:$0xff] %vm223_vm0, %v774_v61 }
 0x112   : > { %v638_v2 = vpop.f32.mrb[4].mxu0  ;;  %v702_v3 = vpop.f32.mrb[4].mxu1 }
 0x113   : > { %v759_v6 = vadd.f32 %v638_v2, %v258_v0  ;;  %v775_v7 = vadd.f32 %v702_v3, %v274_v1  ;;  %v640_v8 = vpop.f32.mrb[5].mxu0  ;;  %v704_v9 = vpop.f32.mrb[5].mxu1 }
 0x114   : > { %v825_v10 = vld [vmem:[#allocation2] sm:$0xff]  ;;  %v641_v12 = vpop.f32.mrb[6].mxu0  ;;  %v705_v13 = vpop.f32.mrb[6].mxu1 }
 0x115   : > { %v841_v11 = vld [vmem:[#allocation2 + $0x80] sm:$0xff]  ;;  %v1238_v14 = vpack.c.bf16 %v825_v10, %v825_v10  ;;  %792 = vst.msk [vmem:[#allocation2 + $0x10] sm:$0xff] %vm223_vm0, %v759_v6  ;;  %808 = vst.msk [vmem:[#allocation2 + $0x90] sm:$0xff] %vm223_vm0, %v775_v7  ;;  %v760_v16 = vadd.f32 %v641_v12, %v259_v4  ;;  %v776_v17 = vadd.f32 %v705_v13, %v275_v5  ;;  %v643_v18 = vpop.f32.mrb[7].mxu0  ;;  %v707_v19 = vpop.f32.mrb[7].mxu1  ;;  %v265_v12 = vld [vmem:[#allocation2 + $0x48] sm:$0xff] }
 0x116   : > { %v1254_v15 = vpack.c.bf16 %v841_v11, %v841_v11  ;;  %v826_v20 = vld [vmem:[#allocation2 + $0x8] sm:$0xff]  ;;  %v264_v8 = vld [vmem:[#allocation2 + $0x40] sm:$0xff] }
 0x117   : > { %v842_v21 = vld [vmem:[#allocation2 + $0x88] sm:$0xff]  ;;  %986 = vst.msk [vmem:[%s1715_s4] sm:$0xf] %vm985_vm4, %v1238_v14  ;;  %v1239_v22 = vpack.c.bf16 %v826_v20, %v826_v20  ;;  %v280_v9 = vld [vmem:[#allocation2 + $0xc0] sm:$0xff] }
 0x118   : > { %1002 = vst.msk [vmem:[%s1715_s4 + $0x40] sm:$0xf] %vm985_vm4, %v1254_v15  ;;  %v1255_v23 = vpack.c.bf16 %v842_v21, %v842_v21  ;;  %v281_v13 = vld [vmem:[#allocation2 + $0xc8] sm:$0xff] }
 0x119   : > { %793 = vst.msk [vmem:[#allocation2 + $0x18] sm:$0xff] %vm223_vm0, %v760_v16  ;;  %809 = vst.msk [vmem:[#allocation2 + $0x98] sm:$0xff] %vm223_vm0, %v776_v17 }
 0x11a   : > { %987 = vst.msk [vmem:[%s1715_s4 + $0x4] sm:$0xf] %vm985_vm4, %v1239_v22  ;;  %1003 = vst.msk [vmem:[%s1715_s4 + $0x44] sm:$0xf] %vm985_vm4, %v1255_v23  ;;  %v646_v26 = vpop.f32.mrb[8].mxu0  ;;  %v710_v27 = vpop.f32.mrb[8].mxu1 }
 0x11b   : > { %v761_v30 = vadd.f32 %v646_v26, %v260_v24  ;;  %v777_v31 = vadd.f32 %v710_v27, %v276_v25  ;;  %v648_v32 = vpop.f32.mrb[9].mxu0  ;;  %v712_v33 = vpop.f32.mrb[9].mxu1 }
 0x11c   : > { %v827_v34 = vld [vmem:[#allocation2 + $0x10] sm:$0xff]  ;;  %v649_v36 = vpop.f32.mrb[10].mxu0  ;;  %v713_v37 = vpop.f32.mrb[10].mxu1 }
 0x11d   : > { %v843_v35 = vld [vmem:[#allocation2 + $0x90] sm:$0xff]  ;;  %v1240_v38 = vpack.c.bf16 %v827_v34, %v827_v34  ;;  %794 = vst.msk [vmem:[#allocation2 + $0x20] sm:$0xff] %vm223_vm0, %v761_v30  ;;  %810 = vst.msk [vmem:[#allocation2 + $0xa0] sm:$0xff] %vm223_vm0, %v777_v31  ;;  %v762_v40 = vadd.f32 %v649_v36, %v261_v28  ;;  %v778_v41 = vadd.f32 %v713_v37, %v277_v29  ;;  %v651_v42 = vpop.f32.mrb[11].mxu0  ;;  %v715_v43 = vpop.f32.mrb[11].mxu1  ;;  %v267_v36 = vld [vmem:[#allocation2 + $0x58] sm:$0xff] }
 0x11e   : > { %v1256_v39 = vpack.c.bf16 %v843_v35, %v843_v35  ;;  %v266_v32 = vld [vmem:[#allocation2 + $0x50] sm:$0xff]  ;;  %v283_v37 = vld [vmem:[#allocation2 + $0xd8] sm:$0xff] }
 0x11f   : > { %988 = vst.msk [vmem:[%s1715_s4 + $0x8] sm:$0xf] %vm985_vm4, %v1240_v38  ;;  %v282_v33 = vld [vmem:[#allocation2 + $0xd0] sm:$0xff] }
 0x120   : > { %v828_v44 = vld [vmem:[#allocation2 + $0x18] sm:$0xff]  ;;  %1004 = vst.msk [vmem:[%s1715_s4 + $0x48] sm:$0xf] %vm985_vm4, %v1256_v39 }
 0x121   : > { %v844_v45 = vld [vmem:[#allocation2 + $0x98] sm:$0xff]  ;;  %v1241_v46 = vpack.c.bf16 %v828_v44, %v828_v44  ;;  %795 = vst.msk [vmem:[#allocation2 + $0x28] sm:$0xff] %vm223_vm0, %v762_v40  ;;  %811 = vst.msk [vmem:[#allocation2 + $0xa8] sm:$0xff] %vm223_vm0, %v778_v41 }
 0x122   : > { %v1257_v47 = vpack.c.bf16 %v844_v45, %v844_v45  ;;  %v654_v50 = vpop.f32.mrb[12].mxu0  ;;  %v718_v51 = vpop.f32.mrb[12].mxu1 }
 0x123   : > { %989 = vst.msk [vmem:[%s1715_s4 + $0xc] sm:$0xf] %vm985_vm4, %v1241_v46  ;;  %v763_v54 = vadd.f32 %v654_v50, %v262_v48  ;;  %v779_v55 = vadd.f32 %v718_v51, %v278_v49  ;;  %v656_v56 = vpop.f32.mrb[13].mxu0  ;;  %v720_v57 = vpop.f32.mrb[13].mxu1 }
 0x124   : > { %1005 = vst.msk [vmem:[%s1715_s4 + $0x4c] sm:$0xf] %vm985_vm4, %v1257_v47  ;;  %v829_v58 = vld [vmem:[#allocation2 + $0x20] sm:$0xff]  ;;  %v657_v60 = vpop.f32.mrb[14].mxu0  ;;  %v721_v61 = vpop.f32.mrb[14].mxu1 }
 0x125   : > { %v845_v59 = vld [vmem:[#allocation2 + $0xa0] sm:$0xff]  ;;  %v1242_v62 = vpack.c.bf16 %v829_v58, %v829_v58  ;;  %796 = vst.msk [vmem:[#allocation2 + $0x30] sm:$0xff] %vm223_vm0, %v763_v54  ;;  %812 = vst.msk [vmem:[#allocation2 + $0xb0] sm:$0xff] %vm223_vm0, %v779_v55  ;;  %v764_v0 = vadd.f32 %v657_v60, %v263_v52  ;;  %v780_v1 = vadd.f32 %v721_v61, %v279_v53  ;;  %v659_v2 = vpop.f32.mrb[15].mxu0  ;;  %v723_v3 = vpop.f32.mrb[15].mxu1  ;;  %v269_v60 = vld [vmem:[#allocation2 + $0x68] sm:$0xff] }
 0x126   : > { %v1258_v63 = vpack.c.bf16 %v845_v59, %v845_v59  ;;  %v268_v56 = vld [vmem:[#allocation2 + $0x60] sm:$0xff]  ;;  %v285_v61 = vld [vmem:[#allocation2 + $0xe8] sm:$0xff] }
 0x127   : > { %990 = vst.msk [vmem:[%s1715_s4 + $0x10] sm:$0xf] %vm985_vm4, %v1242_v62  ;;  %v284_v57 = vld [vmem:[#allocation2 + $0xe0] sm:$0xff] }
 0x128   : > { %v830_v4 = vld [vmem:[#allocation2 + $0x28] sm:$0xff]  ;;  %1006 = vst.msk [vmem:[%s1715_s4 + $0x50] sm:$0xf] %vm985_vm4, %v1258_v63 }
 0x129   : > { %v846_v5 = vld [vmem:[#allocation2 + $0xa8] sm:$0xff]  ;;  %v1243_v6 = vpack.c.bf16 %v830_v4, %v830_v4  ;;  %797 = vst.msk [vmem:[#allocation2 + $0x38] sm:$0xff] %vm223_vm0, %v764_v0  ;;  %813 = vst.msk [vmem:[#allocation2 + $0xb8] sm:$0xff] %vm223_vm0, %v780_v1 }
 0x12a   : > { %v1259_v7 = vpack.c.bf16 %v846_v5, %v846_v5  ;;  %v662_v10 = vpop.f32.mrb[16].mxu0  ;;  %v726_v11 = vpop.f32.mrb[16].mxu1 }
 0x12b   : > { %991 = vst.msk [vmem:[%s1715_s4 + $0x14] sm:$0xf] %vm985_vm4, %v1243_v6  ;;  %v765_v14 = vadd.f32 %v662_v10, %v264_v8  ;;  %v781_v15 = vadd.f32 %v726_v11, %v280_v9  ;;  %v664_v16 = vpop.f32.mrb[17].mxu0  ;;  %v728_v17 = vpop.f32.mrb[17].mxu1 }
 0x12c   : > { %1007 = vst.msk [vmem:[%s1715_s4 + $0x54] sm:$0xf] %vm985_vm4, %v1259_v7  ;;  %v831_v18 = vld [vmem:[#allocation2 + $0x30] sm:$0xff]  ;;  %v665_v20 = vpop.f32.mrb[18].mxu0  ;;  %v729_v21 = vpop.f32.mrb[18].mxu1 }
 0x12d   : > { %v847_v19 = vld [vmem:[#allocation2 + $0xb0] sm:$0xff]  ;;  %v1244_v22 = vpack.c.bf16 %v831_v18, %v831_v18  ;;  %798 = vst.msk [vmem:[#allocation2 + $0x40] sm:$0xff] %vm223_vm0, %v765_v14  ;;  %814 = vst.msk [vmem:[#allocation2 + $0xc0] sm:$0xff] %vm223_vm0, %v781_v15  ;;  %v766_v24 = vadd.f32 %v665_v20, %v265_v12  ;;  %v782_v25 = vadd.f32 %v729_v21, %v281_v13  ;;  %v667_v26 = vpop.f32.mrb[19].mxu0  ;;  %v731_v27 = vpop.f32.mrb[19].mxu1  ;;  %v271_v20 = vld [vmem:[#allocation2 + $0x78] sm:$0xff] }
 0x12e   : > { %v1260_v23 = vpack.c.bf16 %v847_v19, %v847_v19  ;;  %v270_v16 = vld [vmem:[#allocation2 + $0x70] sm:$0xff]  ;;  %v287_v21 = vld [vmem:[#allocation2 + $0xf8] sm:$0xff] }
 0x12f   : > { %992 = vst.msk [vmem:[%s1715_s4 + $0x18] sm:$0xf] %vm985_vm4, %v1244_v22  ;;  %v286_v17 = vld [vmem:[#allocation2 + $0xf0] sm:$0xff] }
 0x130   : > { %v832_v28 = vld [vmem:[#allocation2 + $0x38] sm:$0xff]  ;;  %1008 = vst.msk [vmem:[%s1715_s4 + $0x58] sm:$0xf] %vm985_vm4, %v1260_v23 }
 0x131   : > { %v848_v29 = vld [vmem:[#allocation2 + $0xb8] sm:$0xff]  ;;  %v1245_v30 = vpack.c.bf16 %v832_v28, %v832_v28  ;;  %799 = vst.msk [vmem:[#allocation2 + $0x48] sm:$0xff] %vm223_vm0, %v766_v24  ;;  %815 = vst.msk [vmem:[#allocation2 + $0xc8] sm:$0xff] %vm223_vm0, %v782_v25 }
 0x132   : > { %v1261_v31 = vpack.c.bf16 %v848_v29, %v848_v29  ;;  %v670_v34 = vpop.f32.mrb[20].mxu0  ;;  %v734_v35 = vpop.f32.mrb[20].mxu1 }
 0x133   : > { %993 = vst.msk [vmem:[%s1715_s4 + $0x1c] sm:$0xf] %vm985_vm4, %v1245_v30  ;;  %v767_v38 = vadd.f32 %v670_v34, %v266_v32  ;;  %v783_v39 = vadd.f32 %v734_v35, %v282_v33  ;;  %v672_v40 = vpop.f32.mrb[21].mxu0  ;;  %v736_v41 = vpop.f32.mrb[21].mxu1 }
 0x134   : > { %1009 = vst.msk [vmem:[%s1715_s4 + $0x5c] sm:$0xf] %vm985_vm4, %v1261_v31  ;;  %v833_v42 = vld [vmem:[#allocation2 + $0x40] sm:$0xff]  ;;  %v673_v44 = vpop.f32.mrb[22].mxu0  ;;  %v737_v45 = vpop.f32.mrb[22].mxu1 }
 0x135   : > { %v849_v43 = vld [vmem:[#allocation2 + $0xc0] sm:$0xff]  ;;  %v1246_v46 = vpack.c.bf16 %v833_v42, %v833_v42  ;;  %800 = vst.msk [vmem:[#allocation2 + $0x50] sm:$0xff] %vm223_vm0, %v767_v38  ;;  %816 = vst.msk [vmem:[#allocation2 + $0xd0] sm:$0xff] %vm223_vm0, %v783_v39  ;;  %v768_v48 = vadd.f32 %v673_v44, %v267_v36  ;;  %v784_v49 = vadd.f32 %v737_v45, %v283_v37  ;;  %v675_v50 = vpop.f32.mrb[23].mxu0  ;;  %v739_v51 = vpop.f32.mrb[23].mxu1 }
 0x136   : > { %v1262_v47 = vpack.c.bf16 %v849_v43, %v849_v43 }
 0x137   : > { %994 = vst.msk [vmem:[%s1715_s4 + $0x20] sm:$0xf] %vm985_vm4, %v1246_v46 }
 0x138   : > { %v834_v52 = vld [vmem:[#allocation2 + $0x48] sm:$0xff]  ;;  %1010 = vst.msk [vmem:[%s1715_s4 + $0x60] sm:$0xf] %vm985_vm4, %v1262_v47 }
 0x139   : > { %v850_v53 = vld [vmem:[#allocation2 + $0xc8] sm:$0xff]  ;;  %v1247_v54 = vpack.c.bf16 %v834_v52, %v834_v52  ;;  %801 = vst.msk [vmem:[#allocation2 + $0x58] sm:$0xff] %vm223_vm0, %v768_v48  ;;  %817 = vst.msk [vmem:[#allocation2 + $0xd8] sm:$0xff] %vm223_vm0, %v784_v49 }
 0x13a   : > { %v1263_v55 = vpack.c.bf16 %v850_v53, %v850_v53  ;;  %v678_v58 = vpop.f32.mrb[24].mxu0  ;;  %v742_v59 = vpop.f32.mrb[24].mxu1 }
 0x13b   : > { %995 = vst.msk [vmem:[%s1715_s4 + $0x24] sm:$0xf] %vm985_vm4, %v1247_v54  ;;  %v769_v62 = vadd.f32 %v678_v58, %v268_v56  ;;  %v785_v63 = vadd.f32 %v742_v59, %v284_v57  ;;  %v680_v0 = vpop.f32.mrb[25].mxu0  ;;  %v744_v1 = vpop.f32.mrb[25].mxu1 }
 0x13c   : > { %1011 = vst.msk [vmem:[%s1715_s4 + $0x64] sm:$0xf] %vm985_vm4, %v1263_v55  ;;  %v835_v2 = vld [vmem:[#allocation2 + $0x50] sm:$0xff]  ;;  %v681_v4 = vpop.f32.mrb[26].mxu0  ;;  %v745_v5 = vpop.f32.mrb[26].mxu1 }
 0x13d   : > { %v851_v3 = vld [vmem:[#allocation2 + $0xd0] sm:$0xff]  ;;  %v1248_v6 = vpack.c.bf16 %v835_v2, %v835_v2  ;;  %802 = vst.msk [vmem:[#allocation2 + $0x60] sm:$0xff] %vm223_vm0, %v769_v62  ;;  %818 = vst.msk [vmem:[#allocation2 + $0xe0] sm:$0xff] %vm223_vm0, %v785_v63  ;;  %v770_v8 = vadd.f32 %v681_v4, %v269_v60  ;;  %v786_v9 = vadd.f32 %v745_v5, %v285_v61  ;;  %v683_v10 = vpop.f32.mrb[27].mxu0  ;;  %v747_v11 = vpop.f32.mrb[27].mxu1 }
 0x13e   : > { %v1264_v7 = vpack.c.bf16 %v851_v3, %v851_v3 }
 0x13f   : > { %996 = vst.msk [vmem:[%s1715_s4 + $0x28] sm:$0xf] %vm985_vm4, %v1248_v6 }
 0x140   : > { %v836_v12 = vld [vmem:[#allocation2 + $0x58] sm:$0xff]  ;;  %1012 = vst.msk [vmem:[%s1715_s4 + $0x68] sm:$0xf] %vm985_vm4, %v1264_v7 }
 0x141   : > { %v852_v13 = vld [vmem:[#allocation2 + $0xd8] sm:$0xff]  ;;  %v1249_v14 = vpack.c.bf16 %v836_v12, %v836_v12  ;;  %803 = vst.msk [vmem:[#allocation2 + $0x68] sm:$0xff] %vm223_vm0, %v770_v8  ;;  %819 = vst.msk [vmem:[#allocation2 + $0xe8] sm:$0xff] %vm223_vm0, %v786_v9 }
 0x142   : > { %v1265_v15 = vpack.c.bf16 %v852_v13, %v852_v13  ;;  %v686_v18 = vpop.f32.mrb[28].mxu0  ;;  %v750_v19 = vpop.f32.mrb[28].mxu1 }
 0x143   : > { %997 = vst.msk [vmem:[%s1715_s4 + $0x2c] sm:$0xf] %vm985_vm4, %v1249_v14  ;;  %v771_v22 = vadd.f32 %v686_v18, %v270_v16  ;;  %v787_v23 = vadd.f32 %v750_v19, %v286_v17  ;;  %v688_v24 = vpop.f32.mrb[29].mxu0  ;;  %v752_v25 = vpop.f32.mrb[29].mxu1 }
 0x144   : > { %1013 = vst.msk [vmem:[%s1715_s4 + $0x6c] sm:$0xf] %vm985_vm4, %v1265_v15  ;;  %v837_v26 = vld [vmem:[#allocation2 + $0x60] sm:$0xff]  ;;  %v689_v28 = vpop.f32.mrb[30].mxu0  ;;  %v753_v29 = vpop.f32.mrb[30].mxu1 }
 0x145   : > { %v853_v27 = vld [vmem:[#allocation2 + $0xe0] sm:$0xff]  ;;  %v1250_v30 = vpack.c.bf16 %v837_v26, %v837_v26  ;;  %804 = vst.msk [vmem:[#allocation2 + $0x70] sm:$0xff] %vm223_vm0, %v771_v22  ;;  %820 = vst.msk [vmem:[#allocation2 + $0xf0] sm:$0xff] %vm223_vm0, %v787_v23  ;;  %v772_v32 = vadd.f32 %v689_v28, %v271_v20  ;;  %v788_v33 = vadd.f32 %v753_v29, %v287_v21  ;;  %v691_v34 = vpop.f32.mrb[31].mxu0  ;;  %v755_v35 = vpop.f32.mrb[31].mxu1 }
 0x146   : > { %v1266_v31 = vpack.c.bf16 %v853_v27, %v853_v27 }
 0x147   : > { %998 = vst.msk [vmem:[%s1715_s4 + $0x30] sm:$0xf] %vm985_vm4, %v1250_v30 }
 0x148   : > { %v838_v36 = vld [vmem:[#allocation2 + $0x68] sm:$0xff]  ;;  %1014 = vst.msk [vmem:[%s1715_s4 + $0x70] sm:$0xf] %vm985_vm4, %v1266_v31 }
 0x149   : > { %v854_v37 = vld [vmem:[#allocation2 + $0xe8] sm:$0xff]  ;;  %v1251_v38 = vpack.c.bf16 %v838_v36, %v838_v36  ;;  %805 = vst.msk [vmem:[#allocation2 + $0x78] sm:$0xff] %vm223_vm0, %v772_v32  ;;  %821 = vst.msk [vmem:[#allocation2 + $0xf8] sm:$0xff] %vm223_vm0, %v788_v33 }
 0x14a   : > { %v1267_v39 = vpack.c.bf16 %v854_v37, %v854_v37 }
 0x14b   : > { %999 = vst.msk [vmem:[%s1715_s4 + $0x34] sm:$0xf] %vm985_vm4, %v1251_v38 }
 0x14c   : > { %1015 = vst.msk [vmem:[%s1715_s4 + $0x74] sm:$0xf] %vm985_vm4, %v1267_v39  ;;  %v839_v40 = vld [vmem:[#allocation2 + $0x70] sm:$0xff] }
 0x14d   : > { %v855_v41 = vld [vmem:[#allocation2 + $0xf0] sm:$0xff]  ;;  %v1252_v42 = vpack.c.bf16 %v839_v40, %v839_v40 }
 0x14e   : > { %v1268_v43 = vpack.c.bf16 %v855_v41, %v855_v41 }
 0x14f   : > { %1000 = vst.msk [vmem:[%s1715_s4 + $0x38] sm:$0xf] %vm985_vm4, %v1252_v42 }
 0x150   : > { %v840_v44 = vld [vmem:[#allocation2 + $0x78] sm:$0xff]  ;;  %1016 = vst.msk [vmem:[%s1715_s4 + $0x78] sm:$0xf] %vm985_vm4, %v1268_v43 }
 0x151   : > { %v856_v45 = vld [vmem:[#allocation2 + $0xf8] sm:$0xff]  ;;  %v1253_v46 = vpack.c.bf16 %v840_v44, %v840_v44 }
 0x152   : > { %v1269_v47 = vpack.c.bf16 %v856_v45, %v856_v45 }
 0x153   : > { %1001 = vst.msk [vmem:[%s1715_s4 + $0x3c] sm:$0xf] %vm985_vm4, %v1253_v46 }
 0x154   : > { %1017 = vst.msk [vmem:[%s1715_s4 + $0x7c] sm:$0xf] %vm985_vm4, %v1269_v47 }
 0x155   : > { %1422 = shalt.err (!%p1419_p5)
}
 0x156   : > { %s1423_s24 = scalar_lea.hbm %s1804_s15, 2048  ;;  %s1427_s27 = scalar_lea.hbm %s1866_s2, 4096 }
 0x157   : > { %p1424_p6 = scmp.ne.s32.totalorder %s1804_s15, %s1423_s24  ;;  %p1428_p10 = scmp.lt.u32.totalorder %s1804_s15, %s1866_s2 }
 0x158   : > { %p1429_p11 = scmp.lt.u32.totalorder %s1427_s27, %s1423_s24  ;;  %p1431_p13 = scmp.lt.u32.totalorder %s1423_s24, %s1804_s15 }
 0x159   : > { %p1425_p7 = pnand %p1424_p6, %p1550_p4 }
 0x15a   : > { %p1430_p12 = por %p1429_p11, %p1428_p10 }
 0x15b   : > { %p1426_p9 = pneg %p1425_p7 }
 0x15c   : > { %p1432_p0 = por %p1431_p13, %p1430_p12 }
 0x15e   : > { %p1433_p1 = pnand %p1432_p0, %p1426_p9 }
 0x160   : > { %1436 = shalt.err (!%p1433_p1)
}
 0x161   : > { %s1493_s30 = smov 64   ;;  %s1494_s3 = smov 4  }
 0x162   : > { %1291 = dma.vmem_to_hbm [thread:$0]  (%p1550_p4), %s1806_s6, 2048, %s1804_s15, %s1818_s12, %s1493_s30, %s1493_s30, %s1494_s3  }
 0x163 PF: > { %p1297_p2 = scmp.ge.s32.totalorder %s1487_s14, 2  ;;  %s1048_s4 = sand.u32 1, %s1467_s9  }
 0x164   : > { %s1049_s5 = scalar_lea.sflag [#allocation4], %s1048_s4 }
 0x165   : > { %p1294_p3 = pnand %p1297_p2, %p1557_p8 }
 0x167   : > { %1462 = dma.done.wait (!%p1294_p3), %s1049_s5, 2048  }
 0x168   : > { %1464 = vsyncadd (!%p1294_p3), %s1049_s5, 4294965248  ;;  %s15_s14 = sadd.s32 1, %s1487_s14   ;;  %s1869_s9 = smov %s1471_s10 }
 0x169   : > { %p12_p5 = scmp.ge.s32.totalorder %s15_s14, 4   ;;  %s1870_s10 = smov %s1475_s11 }
 0x16a   : > { %s1871_s11 = smov %s1563_s22  ;;  %s1872_s12 = smov %s1483_s13 }
 0x16b   : > { %s1873_s13 = smov %s1875_s17  ;;  %14 = sbr.rel (!%p12_p5) target bundleno = 4 (0x4), region = 74 }
 0x172   :  { %1054 = vsyncpa [#allocation4], 1 }
 0x173   :  { %1056 = vsyncpa [#allocation4 + $0x1], 1 }

</bundles_post_ra>
